<compile_context>
chip_gen: v7x
topology: tpu7x:2x2x1
jax: 0.10.0
libtpu: 0.0.40
codegen_flags: <defaults>
</compile_context>

<pallas_src>
import jax
import jax.numpy as jnp
from jax.experimental import pallas as pl
from jax.experimental.pallas import tpu as pltpu

OUT_PAD = 128              # packed / lane-dense output width (q1 cols [0,A), q2 col A)
BATCH_TILE = 1024          # max batch tile for the gridded path
SMALL_BATCH_NOGRID = 256   # below this, run one whole-array call (no pipeline prologue)


def _round_up(x, m):
    return ((x + m - 1) // m) * m


# ---------------------------------------------------------------------------
# Fused kernel: 3 lane-dense matmuls, packed (TB, 128) output.
# ---------------------------------------------------------------------------
def _fused_kernel(state_ref, action_ref, w1s_ref, w1a_ref, b1_ref, w2_ref, b2_ref,
                  o_ref):
    # bf16 operands -> native-rate MXU; accumulation / bias / ReLU stay f32.
    s = state_ref[...].astype(jnp.bfloat16)
    a = action_ref[...].astype(jnp.bfloat16)

    # Packed layer 1: cols [0,H) = actor hidden, cols [H,2H) = critic hidden,
    # remaining pad cols stay exactly 0 (zero weights + zero bias, relu(0)=0).
    h = (jnp.dot(s, w1s_ref[...], preferred_element_type=jnp.float32)
         + jnp.dot(a, w1a_ref[...], preferred_element_type=jnp.float32)
         + b1_ref[...])
    h = jnp.maximum(h, 0.0)

    # Packed layer 2: q1 -> cols [0,A), q2 -> col A; pad cols are 0.
    o = (jnp.dot(h.astype(jnp.bfloat16), w2_ref[...],
                 preferred_element_type=jnp.float32)
         + b2_ref[...])
    o_ref[...] = o.astype(o_ref.dtype)


def _cost_estimate(B, S, A, HP):
    flops = 2 * B * (S * HP + A * HP + HP * OUT_PAD)
    bytes_accessed = (4 * B * (S + A + OUT_PAD)              # f32 activations/output
                      + 2 * (S * HP + A * HP + HP * OUT_PAD)  # bf16 weights
                      + 4 * (HP + OUT_PAD))                   # f32 biases
    return pl.CostEstimate(flops=flops, transcendentals=0,
                           bytes_accessed=bytes_accessed)


def _gridded_call(state, action, packed_params, tb, nb, cost, weight_buffer_count):
    B, S = state.shape
    A = action.shape[1]

    def io_spec(feat):
        return pl.BlockSpec((tb, feat), lambda i: (i, 0))

    if weight_buffer_count == 1:
        def w_spec(shape):
            # Constant-index block: fetched once, single-buffered.
            return pl.BlockSpec(shape, lambda i: (0, 0), pipeline_mode=pl.Buffered(1))
    else:
        def w_spec(shape):
            return pl.BlockSpec(shape, lambda i: (0, 0))

    w1s, w1a, b1, w2, b2 = packed_params
    in_specs = [
        io_spec(S),            # state   (tb, S)
        io_spec(A),            # action  (tb, A)
        w_spec(w1s.shape),     # (S, HP)
        w_spec(w1a.shape),     # (A, HP)
        w_spec(b1.shape),      # (1, HP)
        w_spec(w2.shape),      # (HP, OUT_PAD)
        w_spec(b2.shape),      # (1, OUT_PAD)
    ]
    return pl.pallas_call(
        _fused_kernel,
        out_shape=jax.ShapeDtypeStruct((B, OUT_PAD), jnp.float32),
        grid=(nb,),
        in_specs=in_specs,
        out_specs=io_spec(OUT_PAD),
        cost_estimate=cost,
        compiler_params=pltpu.CompilerParams(
            dimension_semantics=("parallel",),
        ),
    )(state, action, *packed_params)


def fused_actor_critic(state, action, packed_params):
    """Returns the packed (B, OUT_PAD) slab: cols [0,A)=q1, col A=q2."""
    B, S = state.shape
    A = action.shape[1]
    HP = packed_params[0].shape[1]
    cost = _cost_estimate(B, S, A, HP)

    if B <= SMALL_BATCH_NOGRID:
        # Tiny batch: single whole-array invocation, no grid / pipeline machinery.
        return pl.pallas_call(
            _fused_kernel,
            out_shape=jax.ShapeDtypeStruct((B, OUT_PAD), jnp.float32),
            cost_estimate=cost,
        )(state, action, *packed_params)

    # Gridded path: even number of grid steps so both v7x TensorCores get
    # balanced work; tile as large as possible (per-step overhead dominates
    # this low-arithmetic kernel). Weights stay VMEM-resident (index_map (0,0)).
    nb = max(2, pl.cdiv(B, BATCH_TILE))
    nb += nb % 2                                   # force even step count
    tb = max(8, _round_up(pl.cdiv(B, nb), 8))
    # NOTE: when B % tb != 0 the final partial tile reads padded rows; there is
    # no cross-batch reduction in this kernel and the out-of-range output rows
    # are masked on store, so this is safe. Do not add batch-axis reductions.
    try:
        return _gridded_call(state, action, packed_params, tb, nb, cost,
                             weight_buffer_count=1)
    except Exception:
        # pl.Buffered(1) unsupported on this jax build -> default double-buffering.
        return _gridded_call(state, action, packed_params, tb, nb, cost,
                             weight_buffer_count=2)


# ---------------------------------------------------------------------------
# Parameter construction / packing (done once, outside the kernel).
# ---------------------------------------------------------------------------
def init_linear(key, in_dim, out_dim):
    """Deterministic PyTorch-like (uniform fan-in) init. W is (in, out)."""
    k_w, k_b = jax.random.split(key)
    bound = 1.0 / jnp.sqrt(jnp.float32(in_dim))
    w = jax.random.uniform(k_w, (in_dim, out_dim), jnp.float32, -bound, bound)
    b = jax.random.uniform(k_b, (1, out_dim), jnp.float32, -bound, bound)
    return w, b


def pack_params(raw_params, state_dim, action_dim, weight_dtype=jnp.bfloat16):
    """Merge actor+critic into 3 lane-dense matmul operands (bf16) + f32 biases."""
    (a_w1, a_b1, a_w2, a_b2), (c_w1, c_b1, c_w2, c_b2) = raw_params
    S, H = a_w1.shape
    A = action_dim
    assert S == state_dim
    assert c_w1.shape[0] == S + A
    assert A + 1 <= OUT_PAD, "packed output requires action_dim + 1 <= 128"
    HP = max(128, _round_up(2 * H, 128))   # packed hidden width (lane-dense)

    w1s = jnp.zeros((S, HP), jnp.float32)
    w1s = w1s.at[:, :H].set(a_w1).at[:, H:2 * H].set(c_w1[:S])
    w1a = jnp.zeros((A, HP), jnp.float32).at[:, H:2 * H].set(c_w1[S:])
    b1 = jnp.zeros((1, HP), jnp.float32)
    b1 = b1.at[:, :H].set(a_b1).at[:, H:2 * H].set(c_b1)

    w2 = jnp.zeros((HP, OUT_PAD), jnp.float32)
    w2 = w2.at[:H, :A].set(a_w2).at[H:2 * H, A:A + 1].set(c_w2)
    b2 = jnp.zeros((1, OUT_PAD), jnp.float32)
    b2 = b2.at[:, :A].set(a_b2).at[:, A:A + 1].set(c_b2)

    return (w1s.astype(weight_dtype), w1a.astype(weight_dtype), b1,
            w2.astype(weight_dtype), b2)


def wrapper_state_action2(state, action, packed_params, action_dim):
    """Mirrors WrapperStateAction2.forward: returns (q1, q2)."""
    out = fused_actor_critic(state, action, packed_params)
    q1 = out[:, :action_dim]
    q2 = out[:, action_dim:action_dim + 1]
    return q1, q2


def reference_forward(state, action, raw_params, compute_dtype=jnp.float32):
    """Pure-JAX reference. With compute_dtype=bfloat16 it mirrors the kernel's
    bf16-operand / f32-accumulate arithmetic (for tight correctness checks)."""
    (a_w1, a_b1, a_w2, a_b2), (c_w1, c_b1, c_w2, c_b2) = raw_params
    S = a_w1.shape[0]
    cast = lambda x: x.astype(compute_dtype)
    s, a = cast(state), cast(action)
    h1 = jnp.dot(s, cast(a_w1), preferred_element_type=jnp.float32) + a_b1
    h1 = jnp.maximum(h1, 0.0)
    q1 = jnp.dot(cast(h1), cast(a_w2), preferred_element_type=jnp.float32) + a_b2
    h2 = (jnp.dot(s, cast(c_w1[:S]), preferred_element_type=jnp.float32)
          + jnp.dot(a, cast(c_w1[S:]), preferred_element_type=jnp.float32)
          + c_b1)
    h2 = jnp.maximum(h2, 0.0)
    q2 = jnp.dot(cast(h2), cast(c_w2), preferred_element_type=jnp.float32) + c_b2
    return q1, q2


if __name__ == "__main__":
    S = 32    # state dim
    A = 16    # action dim
    H = 64    # hidden dim (per net; packed hidden = 2H = 128)

    key = jax.random.PRNGKey(0)
    k_state, k_action, k_a1, k_a2, k_c1, k_c2, k_big = jax.random.split(key, 7)

    # Actor params: S -> H -> A ; Critic params: S+A -> H -> 1
    a_w1, a_b1 = init_linear(k_a1, S, H)
    a_w2, a_b2 = init_linear(k_a2, H, A)
    c_w1, c_b1 = init_linear(k_c1, S + A, H)
    c_w2, c_b2 = init_linear(k_c2, H, 1)
    raw_params = ((a_w1, a_b1, a_w2, a_b2), (c_w1, c_b1, c_w2, c_b2))
    packed_params = pack_params(raw_params, S, A)

    def check(B, ks, ka):
        state = jax.random.normal(ks, (B, S), jnp.float32)
        action = jax.random.normal(ka, (B, A), jnp.float32)
        q1, q2 = wrapper_state_action2(state, action, packed_params, A)
        jax.block_until_ready((q1, q2))
        # Compare against a bf16-matched reference (kernel uses bf16 operands,
        # f32 accumulation), so the tolerance can stay tight.
        r1, r2 = reference_forward(state, action, raw_params,
                                   compute_dtype=jnp.bfloat16)
        assert q1.shape == (B, A) and q2.shape == (B, 1)
        assert q1.dtype == jnp.float32 and q2.dtype == jnp.float32
        assert jnp.allclose(q1, r1, atol=2e-3, rtol=2e-3)
        assert jnp.allclose(q2, r2, atol=2e-3, rtol=2e-3)

    # Small batch: single whole-array (ungridded) path.
    check(8, k_state, k_action)

    # Large batch: gridded path, 2 grid steps of 512 rows (megacore-parallel).
    k_bs, k_ba, k_ps, k_pa = jax.random.split(k_big, 4)
    check(1024, k_bs, k_ba)

    # Ragged batch: exercises the masked partial last tile.
    check(777, k_ps, k_pa)

    print("KERNEL_OK")
</pallas_src>

<mosaic_0001>
module attributes {stable_mosaic.version = 11 : i64} {
  func.func @_fused_kernel(%arg0: memref<8x32xf32, #tpu.memory_space<vmem>>, %arg1: memref<8x16xf32, #tpu.memory_space<vmem>>, %arg2: memref<32x128xbf16, #tpu.memory_space<vmem>>, %arg3: memref<16x128xbf16, #tpu.memory_space<vmem>>, %arg4: memref<1x128xf32, #tpu.memory_space<vmem>>, %arg5: memref<128x128xbf16, #tpu.memory_space<vmem>>, %arg6: memref<1x128xf32, #tpu.memory_space<vmem>>, %arg7: memref<8x128xf32, #tpu.memory_space<vmem>>) attributes {dimension_semantics = [], scalar_prefetch = 0 : i64, scratch_operands = 0 : i64, tpu.core_type = #tpu.core_type<tc>} {
    %c0 = arith.constant 0 : index
    %c0_0 = arith.constant 0 : index
    %0 = vector.load %arg0[%c0, %c0_0] : memref<8x32xf32, #tpu.memory_space<vmem>>, vector<8x32xf32>
    %1 = arith.truncf %0 : vector<8x32xf32> to vector<8x32xbf16>
    %c0_1 = arith.constant 0 : index
    %c0_2 = arith.constant 0 : index
    %2 = vector.load %arg1[%c0_1, %c0_2] : memref<8x16xf32, #tpu.memory_space<vmem>>, vector<8x16xf32>
    %3 = arith.truncf %2 : vector<8x16xf32> to vector<8x16xbf16>
    %c0_3 = arith.constant 0 : index
    %c0_4 = arith.constant 0 : index
    %4 = vector.load %arg2[%c0_3, %c0_4] : memref<32x128xbf16, #tpu.memory_space<vmem>>, vector<32x128xbf16>
    %cst = arith.constant dense<0.000000e+00> : vector<8x128xf32>
    %5 = tpu.matmul %1, %4, %cst {dimension_numbers = #tpu.dot_dimension_numbers<[1], [0], [0], [1], [0, 0, 1, 1], [], []>} : vector<8x32xbf16>, vector<32x128xbf16>, vector<8x128xf32> -> vector<8x128xf32>
    %c0_5 = arith.constant 0 : index
    %c0_6 = arith.constant 0 : index
    %6 = vector.load %arg3[%c0_5, %c0_6] : memref<16x128xbf16, #tpu.memory_space<vmem>>, vector<16x128xbf16>
    %cst_7 = arith.constant dense<0.000000e+00> : vector<8x128xf32>
    %7 = tpu.matmul %3, %6, %cst_7 {dimension_numbers = #tpu.dot_dimension_numbers<[1], [0], [0], [1], [0, 0, 1, 1], [], []>} : vector<8x16xbf16>, vector<16x128xbf16>, vector<8x128xf32> -> vector<8x128xf32>
    %8 = arith.addf %5, %7 : vector<8x128xf32>
    %c0_8 = arith.constant 0 : index
    %c0_9 = arith.constant 0 : index
    %9 = vector.load %arg4[%c0_8, %c0_9] : memref<1x128xf32, #tpu.memory_space<vmem>>, vector<1x128xf32>
    %10 = vector.broadcast %9 : vector<1x128xf32> to vector<8x128xf32>
    %11 = arith.addf %8, %10 : vector<8x128xf32>
    %cst_10 = arith.constant 0.000000e+00 : f32
    %12 = vector.broadcast %cst_10 : f32 to vector<8x128xf32>
    %13 = arith.maximumf %11, %12 : vector<8x128xf32>
    %14 = arith.truncf %13 : vector<8x128xf32> to vector<8x128xbf16>
    %c0_11 = arith.constant 0 : index
    %c0_12 = arith.constant 0 : index
    %15 = vector.load %arg5[%c0_11, %c0_12] : memref<128x128xbf16, #tpu.memory_space<vmem>>, vector<128x128xbf16>
    %cst_13 = arith.constant dense<0.000000e+00> : vector<8x128xf32>
    %16 = tpu.matmul %14, %15, %cst_13 {dimension_numbers = #tpu.dot_dimension_numbers<[1], [0], [0], [1], [0, 0, 1, 1], [], []>} : vector<8x128xbf16>, vector<128x128xbf16>, vector<8x128xf32> -> vector<8x128xf32>
    %c0_14 = arith.constant 0 : index
    %c0_15 = arith.constant 0 : index
    %17 = vector.load %arg6[%c0_14, %c0_15] : memref<1x128xf32, #tpu.memory_space<vmem>>, vector<1x128xf32>
    %18 = vector.broadcast %17 : vector<1x128xf32> to vector<8x128xf32>
    %19 = arith.addf %16, %18 : vector<8x128xf32>
    %c0_16 = arith.constant 0 : index
    %c0_17 = arith.constant 0 : index
    %20 = vector.load %arg7[%c0_16, %c0_17] : memref<8x128xf32, #tpu.memory_space<vmem>>, vector<8x128xf32>
    tpu.vector_store %arg7[%c0_16, %c0_17], %19 {strides = array<i32>} : memref<8x128xf32, #tpu.memory_space<vmem>>, vector<8x128xf32>,
    return
  }
}

</mosaic_0001>

<bundles_post_ra>
// kernel: tpu_custom_call.1
= control target key start
LH: loop header
LB: loop body
LE: loop exit
PB: predicated region body
PF: predicated region fallthrough
CT: control target
= control target key end

     0   :  { %12 = vsyncpa [#allocation3], 0  ;;  %s653_s0 = inlined_call_operand.hbm [shape: f32[8,32], index: 0, kind: input, shape index: {}]   ;;  %s654_s1 = inlined_call_operand.hbm [shape: f32[8,16], index: 1, kind: input, shape index: {}]   ;;  %s655_s2 = inlined_call_operand.hbm [shape: bf16[32,128], index: 2, kind: input, shape index: {}]   ;;  %s656_s3 = inlined_call_operand.vmem [shape: bf16[16,128], index: 3, kind: input, shape index: {}]   ;;  %s657_s4 = inlined_call_operand.vmem [shape: f32[1,128], index: 4, kind: input, shape index: {}]   ;;  %s658_s5 = inlined_call_operand.hbm [shape: bf16[128,128], index: 5, kind: input, shape index: {}]   ;;  %s659_s6 = inlined_call_operand.vmem [shape: f32[1,128], index: 6, kind: input, shape index: {}]   ;;  %s660_s7 = inlined_call_operand.hbm [shape: f32[8,128], index: 7, kind: output, shape index: {}]  }
   0x1   :  { %13 = vsyncpa [#allocation6], 0 }
   0x2   :  { %14 = vsyncpa [#allocation9], 0 }
   0x3   :  { %15 = vsyncpa [#allocation4], 0  ;;  %s535_s24 = smov [#allocation5]   ;;  %s536_s26 = smov [#allocation2]  }
   0x4   :  { %s32_s25 = sshll.u32 %s535_s24, 4  ;;  %s22_s27 = sshll.u32 %s536_s26, 4  ;;  %s33_s25 = int_to_ptr.vmem [resolvable:$true] %s32_s25  ;;  %s23_s27 = int_to_ptr.vmem [resolvable:$true] %s22_s27 }
   0x5   :  { %s417_s30 = scalar_lea.hbm %s654_s1, 128 }
   0x6   :  { %p418_p0 = scmp.ne.s32.totalorder %s654_s1, %s417_s30  ;;  %p421_p1 = scmp.lt.u32.totalorder %s417_s30, %s654_s1 }
   0x8   :  { %p423_p2 = pnand %p421_p1, %p418_p0 }
   0xa   :  { %426 = shalt.err (!%p423_p2)
}
   0xb   :  { %s427_s12 = scalar_lea.vmem %s33_s25, 128  ;;  %p432_p4 = scmp.lt.s32.totalorder %s33_s25, %s33_s25 }
   0xc   :  { %p428_p3 = scmp.ne.s32.totalorder %s33_s25, %s427_s12  ;;  %p433_p5 = scmp.lt.s32.totalorder %s427_s12, %s427_s12 }
   0xe   :  { %p434_p6 = por %p433_p5, %p432_p4 }
  0x10   :  { %p435_p7 = pnand %p434_p6, %p428_p3 }
  0x12   :  { %438 = shalt.err (!%p435_p7)
}
  0x13   :  { %35 = dma.hbm_to_vmem [thread:$0]  %s654_s1, 128, %s33_s25, [#allocation6]  }
  0x14   :  { %s439_s17 = scalar_lea.hbm %s653_s0, 128 }
  0x15   :  { %p440_p8 = scmp.ne.s32.totalorder %s653_s0, %s439_s17  ;;  %p443_p9 = scmp.lt.u32.totalorder %s439_s17, %s653_s0 }
  0x17   :  { %p445_p10 = pnand %p443_p9, %p440_p8 }
  0x19   :  { %448 = shalt.err (!%p445_p10)
}
  0x1a   :  { %s449_s22 = scalar_lea.vmem %s23_s27, 128  ;;  %p454_p12 = scmp.lt.s32.totalorder %s23_s27, %s23_s27 }
  0x1b   :  { %p450_p11 = scmp.ne.s32.totalorder %s23_s27, %s449_s22  ;;  %p455_p13 = scmp.lt.s32.totalorder %s449_s22, %s449_s22 }
  0x1d   :  { %p456_p0 = por %p455_p13, %p454_p12 }
  0x1f   :  { %p457_p1 = pnand %p456_p0, %p450_p11 }
  0x21   :  { %460 = shalt.err (!%p457_p1)
}
  0x22   :  { %25 = dma.hbm_to_vmem [thread:$0]  %s653_s0, 128, %s23_s27, [#allocation3]  }
  0x23   :  { %s537_s24 = smov [#allocation7]   ;;  %s461_s29 = scalar_lea.hbm %s655_s2, 256 }
  0x24   :  { %s41_s25 = sshll.u32 %s537_s24, 4  ;;  %p462_p2 = scmp.ne.s32.totalorder %s655_s2, %s461_s29  ;;  %s42_s25 = int_to_ptr.vmem [resolvable:$true] %s41_s25 }
  0x25   :  { %p465_p3 = scmp.lt.u32.totalorder %s461_s29, %s655_s2 }
  0x27   :  { %p467_p4 = pnand %p465_p3, %p462_p2 }
  0x29   :  { %470 = shalt.err (!%p467_p4)
}
  0x2a   :  { %s471_s11 = scalar_lea.vmem %s42_s25, 256  ;;  %p476_p6 = scmp.lt.s32.totalorder %s42_s25, %s42_s25 }
  0x2b   :  { %p472_p5 = scmp.ne.s32.totalorder %s42_s25, %s471_s11  ;;  %p477_p7 = scmp.lt.s32.totalorder %s471_s11, %s471_s11 }
  0x2d   :  { %p478_p8 = por %p477_p7, %p476_p6 }
  0x2f   :  { %p479_p9 = pnand %p478_p8, %p472_p5 }
  0x31   :  { %482 = shalt.err (!%p479_p9)
}
  0x32   :  { %s538_s0 = smov 64   ;;  %s539_s27 = smov 4  }
  0x33   :  { %47 = dma.hbm_to_vmem [thread:$0]  %s655_s2, 256, %s42_s25, [#allocation6], %s538_s0, %s538_s0, %s539_s27  }
  0x34   :  { %s540_s14 = smov [#allocation8]   ;;  %s483_s18 = scalar_lea.hbm %s658_s5, 1024 }
  0x35   :  { %s57_s15 = sshll.u32 %s540_s14, 4  ;;  %p484_p10 = scmp.ne.s32.totalorder %s658_s5, %s483_s18  ;;  %s58_s15 = int_to_ptr.vmem [resolvable:$true] %s57_s15 }
  0x36   :  { %p487_p11 = scmp.lt.u32.totalorder %s483_s18, %s658_s5 }
  0x38   :  { %p489_p12 = pnand %p487_p11, %p484_p10 }
  0x3a   :  { %492 = shalt.err (!%p489_p12)
}
  0x3b   :  { %s493_s1 = scalar_lea.vmem %s58_s15, 1024  ;;  %p498_p0 = scmp.lt.s32.totalorder %s58_s15, %s58_s15 }
  0x3c   :  { %p494_p13 = scmp.ne.s32.totalorder %s58_s15, %s493_s1  ;;  %p499_p1 = scmp.lt.s32.totalorder %s493_s1, %s493_s1 }
  0x3e   :  { %p500_p2 = por %p499_p1, %p498_p0 }
  0x40   :  { %p501_p3 = pnand %p500_p2, %p494_p13 }
  0x42   :  { %504 = shalt.err (!%p501_p3)
}
  0x43   :  { %63 = dma.hbm_to_vmem [thread:$0]  %s658_s5, 1024, %s58_s15, [#allocation9], %s538_s0, %s538_s0, %s539_s27  }
  0x44   :  { %527 = dma.done.wait [#allocation3], 128  }
  0x45   :  { %528 = vsyncadd [#allocation3], 4294967168 }
  0x46   :  { %529 = dma.done.wait [#allocation6], 384  }
  0x47   :  { %530 = vsyncadd [#allocation6], 4294966912 }
  0x48   :  { %531 = dma.done.wait [#allocation9], 1024  }
  0x49   :  { %532 = vsyncadd [#allocation9], 4294966272  ;;  %v541_v0 = vmov 0.0   ;;  %vm542_vm0 = vmmov 0   ;;  %v406_v1 = vld [vmem:[%s656_s3] sm:$0xff]   ;;  %v81_v2 = vld [vmem:[#allocation5] sm:$0xff] }
  0x4a   :  { %363 = vmatprep.subr.bf16.mxu1 %v541_v0  ;;  %365 = vmatprep.mubr.msk.bf16.mxu1 %vm542_vm0, %v541_v0  ;;  %v82_v3 = vpack.c.bf16 %v81_v2, %v81_v2  ;;  %vm95_vm1 = vcmask 130048   ;;  %v407_v4 = vld [vmem:[#allocation7] sm:$0xff]   ;;  %v409_v5 = vld [vmem:[#allocation8] sm:$0xff]   ;;  %v408_v6 = vld [vmem:[#allocation7 + $0x8] sm:$0xff]   ;;  %vm151_vm2 = vcmask 261120   ;;  %s543_s29 = smov [#allocation10]  }
  0x4b   :  { %377 = vmatprep.subr.bf16.mxu0 %v541_v0  ;;  %393 = vmatprep.mubr.msk.bf16.mxu0 %vm542_vm0, %v541_v0  ;;  %v79_v7 = vld [vmem:[#allocation2] sm:$0xff]  ;;  %v410_v8 = vld [vmem:[#allocation8 + $0x8] sm:$0xff]   ;;  %v411_v10 = vld [vmem:[#allocation8 + $0x10] sm:$0xff]   ;;  %s323_s30 = sshll.u32 %s543_s29, 4  ;;  %s324_s30 = int_to_ptr.vmem [resolvable:$true] %s323_s30 }
  0x4c   :  { %364 = vmatpush3.bf16.msra.mxu1 %v406_v1  ;;  %378 = vmatpush3.bf16.msra.mxu0 %v409_v5  ;;  %v80_v9 = vpack.c.bf16 %v79_v7, %v79_v7  ;;  %v412_v11 = vld [vmem:[#allocation8 + $0x18] sm:$0xff]   ;;  %v413_v12 = vld [vmem:[#allocation8 + $0x20] sm:$0xff]   ;;  %v414_v13 = vld [vmem:[#allocation8 + $0x28] sm:$0xff]   ;;  %p510_p5 = scmp.lt.s32.totalorder %s324_s30, %s324_s30 }
  0x4d   :  { %369 = vmatprep.subr.bf16.mxu1 %v541_v0  ;;  %379 = vmatprep.subr.bf16.mxu0 %v541_v0  ;;  %v415_v14 = vld [vmem:[#allocation8 + $0x30] sm:$0xff]   ;;  %v416_v15 = vld [vmem:[#allocation8 + $0x38] sm:$0xff]   ;;  %v339_v21 = vld [vmem:[%s657_s4] ss:$0 sm:$0xff]  ;;  %s505_s4 = scalar_lea.vmem %s324_s30, 128 }
  0x4e   :  { %v340_v29 = vld [vmem:[%s659_s6] ss:$0 sm:$0xff]  ;;  %p506_p4 = scmp.ne.s32.totalorder %s324_s30, %s505_s4  ;;  %p511_p6 = scmp.lt.s32.totalorder %s505_s4, %s505_s4 }
  0x4f   :  { %366 = vmatmul.mubr.msk.bf16.vlgmr.msra.gmra.mrb[0].mxu1 %vm95_vm1, %v82_v3 }
  0x50   :  { %370 = vmatpush3.bf16.msra.mxu1 %v407_v4  ;;  %373 = vmatprep.mubr.msk.bf16.mxu1 %vm542_vm0, %v541_v0  ;;  %p512_p7 = por %p511_p6, %p510_p5 }
  0x51   :  { %371 = vmatprep.subr.bf16.mxu1 %v541_v0  ;;  %380 = vmatpush3.bf16.msra.mxu0 %v410_v8 }
  0x52   :  { %381 = vmatprep.subr.bf16.mxu0 %v541_v0  ;;  %p513_p8 = pnand %p512_p7, %p506_p4 }
  0x54   :  { %372 = vmatpush3.bf16.msra.mxu1 %v408_v6 }
  0x55   :  { %382 = vmatpush3.bf16.msra.mxu0 %v411_v10 }
  0x56   :  { %383 = vmatprep.subr.bf16.mxu0 %v541_v0 }
  0x57   :  { %374 = vmatmul.mubr.msk.bf16.vlgmr.msra.gmra.mrb[4].mxu1 %vm151_vm2, %v80_v9 }
  0x59   :  { %384 = vmatpush3.bf16.msra.mxu0 %v412_v11 }
  0x5a   :  { %385 = vmatprep.subr.bf16.mxu0 %v541_v0 }
  0x5d   :  { %386 = vmatpush3.bf16.msra.mxu0 %v413_v12 }
  0x5e   :  { %387 = vmatprep.subr.bf16.mxu0 %v541_v0 }
  0x61   :  { %388 = vmatpush3.bf16.msra.mxu0 %v414_v13 }
  0x62   :  { %389 = vmatprep.subr.bf16.mxu0 %v541_v0 }
  0x65   :  { %390 = vmatpush3.bf16.msra.mxu0 %v415_v14 }
  0x66   :  { %391 = vmatprep.subr.bf16.mxu0 %v541_v0 }
  0x69   :  { %392 = vmatpush3.bf16.msra.mxu0 %v416_v15 }
 0x122   :  { %v133_v16 = vpop.f32.mrb[0].mxu1 }
 0x123   :  { %v367_v17 = vpop.f32.mrb[1].mxu1 }
 0x124   :  { %v136_v18 = vpop.f32.mrb[2].mxu1 }
 0x125   :  { %v368_v19 = vpop.f32.mrb[3].mxu1 }
 0x12a   :  { %v189_v20 = vpop.f32.mrb[4].mxu1 }
 0x12b   :  { %v190_v22 = vadd.f32 %v189_v20, %v133_v16  ;;  %v375_v23 = vpop.f32.mrb[5].mxu1 }
 0x12c   :  { %v192_v24 = vpop.f32.mrb[6].mxu1 }
 0x12d   :  { %v202_v25 = vadd.f32 %v339_v21, %v190_v22  ;;  %v376_v26 = vpop.f32.mrb[7].mxu1 }
 0x12f   :  { %v203_v27 = vmax.f32 %v202_v25, 0.0 }
 0x131   :  { %v204_v28 = vpack.c.bf16 %v203_v27, %v203_v27 }
 0x133   :  { %394 = vmatmul.mubr.bf16.vlgmr.msra.gmra.mrb[0].mxu0 %v204_v28 }
 0x206   :  { %v310_v30 = vpop.f32.mrb[0].mxu0 }
 0x207   :  { %v311_v31 = vadd.f32 %v340_v29, %v310_v30  ;;  %v395_v32 = vpop.f32.mrb[1].mxu0 }
 0x208   :  { %v313_v33 = vpop.f32.mrb[2].mxu0 }
 0x209   :  { %316 = vst [vmem:[#allocation10] sm:$0xff] %v311_v31  ;;  %v396_v34 = vpop.f32.mrb[3].mxu0 }
 0x20a   :  { %516 = shalt.err (!%p513_p8)
}
 0x20b   :  { %s517_s6 = scalar_lea.hbm %s660_s7, 128 }
 0x20c   :  { %p518_p9 = scmp.ne.s32.totalorder %s660_s7, %s517_s6  ;;  %p521_p10 = scmp.lt.u32.totalorder %s517_s6, %s660_s7 }
 0x20e   :  { %p523_p11 = pnand %p521_p10, %p518_p9 }
 0x210   :  { %526 = shalt.err (!%p523_p11)
}
 0x211   :  { %326 = dma.vmem_to_hbm [thread:$0]  %s324_s30, 128, %s660_s7, [#allocation4]  }
 0x212   :  { %533 = dma.done.wait [#allocation4], 128  }
 0x213   :  { %534 = vsyncadd [#allocation4], 4294967168 }
 0x214   :  { %330 = vsyncpa [#allocation3], 1 }
 0x215   :  { %331 = vsyncpa [#allocation6], 1 }
 0x216   :  { %332 = vsyncpa [#allocation9], 1 }
 0x217   :  { %333 = vsyncpa [#allocation4], 1 }

</bundles_post_ra>
